<compile_context>
chip_gen: v7x
topology: tpu7x:2x2x1
jax: 0.10.0
libtpu: 0.0.40
codegen_flags: <defaults>
</compile_context>

<pallas_src>
import functools
import math

import jax
import jax.numpy as jnp
from jax.experimental import pallas as pl
from jax.experimental.pallas import tpu as pltpu

ETA = 2.58
K = 8.21

# Input slab row layout (channel-major, N lane-dense):
#   0: light, 1: distance, 2: alpha,
#   3-5: normal xyz, 6-8: viewdir xyz,
#   9-11: diffuse_albedo rgb, 12-14: specular_albedo rgb
_N_IN_ROWS = 15
# Output slab rows: 0-2 diffuse_rgb, 3-5 specular_rgb, 6-8 rgb
_N_OUT_ROWS = 9
_LANES = 128


def _round_up(x, m):
    return ((x + m - 1) // m) * m


def _rough_conductor_kernel(in_ref, out_ref, *, eta, k):
    # Every in_ref[i] / out_ref[i] is a full [TM, 128] tile.
    f32 = jnp.float32
    odt = out_ref.dtype

    light = in_ref[0].astype(f32)
    dist = in_ref[1].astype(f32)
    alpha = jnp.maximum(in_ref[2].astype(f32), 0.0001)

    light_intensity = light / (dist * dist + 1e-10)
    diff_factor = light_intensity * 0.0001

    # Diffuse rows stored early: diff_factor and the diffuse-albedo tiles die
    # before the long Fresnel/GGX chain (keeps per-vreg live set small).
    out_ref[0] = (in_ref[9].astype(f32) * diff_factor).astype(odt)
    out_ref[1] = (in_ref[10].astype(f32) * diff_factor).astype(odt)
    out_ref[2] = (in_ref[11].astype(f32) * diff_factor).astype(odt)

    # view . normal as elementwise FMAs on lane-dense tiles (no lane reduce).
    dot = (in_ref[3].astype(f32) * in_ref[6].astype(f32)
           + in_ref[4].astype(f32) * in_ref[7].astype(f32)
           + in_ref[5].astype(f32) * in_ref[8].astype(f32))
    dot = jnp.clip(dot, 1e-05, 0.99999)
    inv_dot = 1.0 / (dot + 1e-10)        # shared: tanTheta + specular denom
    cos2 = dot * dot
    sin2 = 1.0 - cos2

    # GGX NDF
    a2 = alpha * alpha
    root = cos2 + sin2 / (a2 + 1e-10)
    D = 1.0 / (math.pi * a2 * root * root + 1e-10)

    # Fresnel (conductor, exact)
    sin4 = sin2 * sin2
    temp1 = (eta * eta - k * k) - sin2
    a2pb2 = jnp.sqrt(temp1 * temp1 + (4.0 * k * k * eta * eta))
    a_c = jnp.sqrt(0.5 * (a2pb2 + temp1))
    term1 = a2pb2 + cos2
    term2 = 2.0 * a_c * dot
    rs2 = (term1 - term2) / (term1 + term2)
    term3 = a2pb2 * cos2 + sin4
    term4 = term2 * sin2
    rp2 = rs2 * (term3 - term4) / (term3 + term4)
    F = 0.5 * (rp2 + rs2)

    # Smith G1^2 (co-located view/light).  hypot(r,1) == sqrt(r*r+1) here:
    # dot >= 1e-5 => r <= alpha/1e-5 ~ 8e4, so r^2 is well inside f32 range.
    r = alpha * jnp.sqrt(sin2) * inv_dot
    g1 = 2.0 / (1.0 + jnp.sqrt(r * r + 1.0))
    G = g1 * g1

    # 0.25*inv_dot replaces /(4*dot+1e-10); dot >= 1e-5 keeps the eps shift
    # well inside rtol=1e-4.
    spec_factor = light_intensity * F * D * G * (0.25 * inv_dot)

    s0 = in_ref[12].astype(f32) * spec_factor
    s1 = in_ref[13].astype(f32) * spec_factor
    s2 = in_ref[14].astype(f32) * spec_factor
    out_ref[3] = s0.astype(odt)
    out_ref[4] = s1.astype(odt)
    out_ref[5] = s2.astype(odt)

    # rgb computed in-kernel: diffuse is reloaded from the VMEM output buffer
    # (a vld) rather than kept live across the whole chain.
    out_ref[6] = (out_ref[0].astype(f32) + s0).astype(odt)
    out_ref[7] = (out_ref[1].astype(f32) + s1).astype(odt)
    out_ref[8] = (out_ref[2].astype(f32) + s2).astype(odt)


def rough_conductor_coloc_render_slab(slab, *, eta=ETA, k=K, tile_rows=1024):
    """Channel-major (SoA) entry point — preferred for TPU pipelines.

    slab: [15, N] with rows (light, distance, alpha, normal.xyz, viewdir.xyz,
          diffuse_albedo.rgb, specular_albedo.rgb); f32 or bf16.
    Returns [9, N]: rows 0-2 diffuse_rgb, 3-5 specular_rgb, 6-8 rgb.
    """
    assert slab.shape[0] == _N_IN_ROWS
    n = slab.shape[1]
    dtype = slab.dtype
    itemsize = jnp.dtype(dtype).itemsize

    g = pl.cdiv(n, _LANES)                     # sublane rows of 128 lanes
    # Tile rows: multiple of 16 (legal for both f32 (8,128) and bf16 (16,128)).
    tm = min(_round_up(int(tile_rows), 16), _round_up(max(g, 1), 16))
    blocks = pl.cdiv(g, tm)
    if blocks > 1 and blocks % 2 == 1:
        # v7x has 2 TensorCores sharing the "parallel" grid axis — keep the
        # step count even so both cores get equal work (no-op on v5e/v6e).
        blocks += 1
        tm = _round_up(pl.cdiv(g, blocks), 16)
    g_pad = blocks * tm
    n_pad = g_pad * _LANES
    if n_pad != n:
        slab = jnp.pad(slab, ((0, 0), (0, n_pad - n)))
    slab = slab.reshape(_N_IN_ROWS, g_pad, _LANES)

    # Double-buffered block footprint + slack; passed explicitly so TM=1024
    # also works under v5e's 16 MiB default scoped-VMEM limit.
    block_bytes = (_N_IN_ROWS + _N_OUT_ROWS) * tm * _LANES * itemsize
    vmem_limit = int(2 * block_bytes + (4 << 20))

    cost = pl.CostEstimate(
        flops=60 * n_pad,
        transcendentals=12 * n_pad,
        bytes_accessed=(_N_IN_ROWS + _N_OUT_ROWS) * n_pad * itemsize,
    )

    kernel = functools.partial(_rough_conductor_kernel,
                               eta=float(eta), k=float(k))

    out_slab = pl.pallas_call(
        kernel,
        out_shape=jax.ShapeDtypeStruct((_N_OUT_ROWS, g_pad, _LANES), dtype),
        grid_spec=pltpu.PrefetchScalarGridSpec(
            num_scalar_prefetch=0,
            grid=(blocks,),
            in_specs=[pl.BlockSpec((_N_IN_ROWS, tm, _LANES),
                                   lambda i: (0, i, 0))],
            out_specs=pl.BlockSpec((_N_OUT_ROWS, tm, _LANES),
                                   lambda i: (0, i, 0)),
        ),
        compiler_params=pltpu.CompilerParams(
            dimension_semantics=("parallel",),
            vmem_limit_bytes=vmem_limit),
        cost_estimate=cost,
    )(slab)

    return out_slab.reshape(_N_OUT_ROWS, n_pad)[:, :n]


def rough_conductor_coloc_render(light, distance, normal, viewdir,
                                 diffuse_albedo, specular_albedo, alpha,
                                 *, eta=ETA, k=K, tile_rows=1024,
                                 dtype=jnp.float32):
    """Drop-in wrapper matching the torch forward (AoS [..., C] in/out).

    NOTE: this wrapper pays an AoS->SoA transpose on input and a minor-dim-3
    interleave on output (both extra HBM passes).  For TPU-resident pipelines
    keep data channel-major and call rough_conductor_coloc_render_slab().
    """
    batch_shape = normal.shape[:-1]
    n = math.prod(batch_shape) if batch_shape else 1

    def row(x, c):
        return jnp.asarray(x, dtype)[..., c].reshape(n)

    rows = [
        row(light, 0), row(distance, 0), row(alpha, 0),
        row(normal, 0), row(normal, 1), row(normal, 2),
        row(viewdir, 0), row(viewdir, 1), row(viewdir, 2),
        row(diffuse_albedo, 0), row(diffuse_albedo, 1), row(diffuse_albedo, 2),
        row(specular_albedo, 0), row(specular_albedo, 1), row(specular_albedo, 2),
    ]
    slab = jnp.stack(rows, axis=0)                      # [15, N]

    out = rough_conductor_coloc_render_slab(
        slab, eta=eta, k=k, tile_rows=tile_rows)        # [9, N]

    def unrow(rs):
        return jnp.moveaxis(rs, 0, -1).reshape(*batch_shape, 3)

    return {'diffuse_rgb': unrow(out[0:3]),
            'specular_rgb': unrow(out[3:6]),
            'rgb': unrow(out[6:9])}


def _fresnel_conductor_exact_ref(cos_i, eta, k):
    cos2 = cos_i * cos_i
    sin2 = 1.0 - cos2
    sin4 = sin2 * sin2
    temp1 = eta * eta - k * k - sin2
    a2pb2 = jnp.sqrt(temp1 * temp1 + 4.0 * k * k * eta * eta)
    a = jnp.sqrt(0.5 * (a2pb2 + temp1))
    term1 = a2pb2 + cos2
    term2 = 2.0 * a * cos_i
    rs2 = (term1 - term2) / (term1 + term2)
    term3 = a2pb2 * cos2 + sin4
    term4 = term2 * sin2
    rp2 = rs2 * (term3 - term4) / (term3 + term4)
    return 0.5 * (rp2 + rs2)


def _reference(light, distance, normal, viewdir, diffuse_albedo,
               specular_albedo, alpha, eta=ETA, k=K):
    """Pure-JAX mirror of the torch forward (correctness check)."""
    light_intensity = light / (distance * distance + 1e-10)
    dot = jnp.sum(viewdir * normal, axis=-1, keepdims=True)
    dot = jnp.clip(dot, 1e-05, 0.99999)
    alpha = jnp.maximum(alpha, 0.0001)
    cos2 = dot * dot
    root = cos2 + (1.0 - cos2) / (alpha * alpha + 1e-10)
    D = 1.0 / (math.pi * alpha * alpha * root * root + 1e-10)
    F = _fresnel_conductor_exact_ref(dot, eta, k)
    sin_t = jnp.sqrt(1.0 - cos2)
    tan_t = sin_t / (dot + 1e-10)
    r = alpha * tan_t
    g1 = 2.0 / (1.0 + jnp.hypot(r, jnp.ones_like(r)))
    G = g1 * g1
    specular_rgb = (light_intensity * specular_albedo * F * D * G
                    / (4.0 * dot + 1e-10))
    diffuse_rgb = light_intensity * diffuse_albedo * 0.0001
    return {'diffuse_rgb': diffuse_rgb, 'specular_rgb': specular_rgb,
            'rgb': diffuse_rgb + specular_rgb}


if __name__ == "__main__":
    key = jax.random.PRNGKey(0)
    k1, k2, k3, k4, k5, k6, k7 = jax.random.split(key, 7)

    batch = (2, 128)  # N = 256 rays
    light = jax.random.uniform(k1, (*batch, 1), jnp.float32, 0.5, 2.0)
    distance = jax.random.uniform(k2, (*batch, 1), jnp.float32, 0.5, 3.0)

    normal = jax.random.normal(k3, (*batch, 3), jnp.float32)
    normal = normal / jnp.linalg.norm(normal, axis=-1, keepdims=True)
    viewdir = jax.random.normal(k4, (*batch, 3), jnp.float32)
    viewdir = viewdir / jnp.linalg.norm(viewdir, axis=-1, keepdims=True)

    diffuse_albedo = jax.random.uniform(k5, (*batch, 3), jnp.float32)
    specular_albedo = jax.random.uniform(k6, (*batch, 3), jnp.float32)
    alpha = jax.random.uniform(k7, (*batch, 1), jnp.float32, 0.05, 0.8)

    out = rough_conductor_coloc_render(
        light, distance, normal, viewdir,
        diffuse_albedo, specular_albedo, alpha)
    jax.block_until_ready(out)

    ref = _reference(light, distance, normal, viewdir,
                     diffuse_albedo, specular_albedo, alpha)
    for name in ('diffuse_rgb', 'specular_rgb', 'rgb'):
        assert out[name].shape == (*batch, 3), name
        assert jnp.allclose(out[name], ref[name], rtol=1e-4, atol=1e-6), name

    print("KERNEL_OK")
</pallas_src>

<mosaic_0001>
module attributes {stable_mosaic.version = 11 : i64} {
  func.func @_rough_conductor_kernel(%arg0: i32, %arg1: memref<15x16x128xf32, #tpu.memory_space<vmem>>, %arg2: memref<9x16x128xf32, #tpu.memory_space<vmem>>) attributes {dimension_semantics = [#tpu.dimension_semantics<parallel>], iteration_bounds = array<i64: 1>, scalar_prefetch = 0 : i64, scratch_operands = 0 : i64, tpu.core_type = #tpu.core_type<tc>, window_params = [{transform_indices = @transform_0, window_bounds = array<i64: 15, 16, 128>}, {transform_indices = @transform_1, window_bounds = array<i64: 9, 16, 128>}]} {
    %c0 = arith.constant 0 : index
    %c0_0 = arith.constant 0 : index
    %c0_1 = arith.constant 0 : index
    %0 = vector.load %arg1[%c0, %c0_0, %c0_1] : memref<15x16x128xf32, #tpu.memory_space<vmem>>, vector<1x16x128xf32>
    %1 = vector.shape_cast %0 : vector<1x16x128xf32> to vector<16x128xf32>
    %c1 = arith.constant 1 : index
    %c0_2 = arith.constant 0 : index
    %c0_3 = arith.constant 0 : index
    %2 = vector.load %arg1[%c1, %c0_2, %c0_3] : memref<15x16x128xf32, #tpu.memory_space<vmem>>, vector<1x16x128xf32>
    %3 = vector.shape_cast %2 : vector<1x16x128xf32> to vector<16x128xf32>
    %c2 = arith.constant 2 : index
    %c0_4 = arith.constant 0 : index
    %c0_5 = arith.constant 0 : index
    %4 = vector.load %arg1[%c2, %c0_4, %c0_5] : memref<15x16x128xf32, #tpu.memory_space<vmem>>, vector<1x16x128xf32>
    %5 = vector.shape_cast %4 : vector<1x16x128xf32> to vector<16x128xf32>
    %cst = arith.constant 9.99999974E-5 : f32
    %6 = vector.broadcast %cst : f32 to vector<16x128xf32>
    %7 = arith.maximumf %5, %6 : vector<16x128xf32>
    %8 = arith.mulf %3, %3 : vector<16x128xf32>
    %cst_6 = arith.constant 1.000000e-10 : f32
    %9 = vector.broadcast %cst_6 : f32 to vector<16x128xf32>
    %10 = arith.addf %8, %9 : vector<16x128xf32>
    %11 = arith.divf %1, %10 : vector<16x128xf32>
    %cst_7 = arith.constant 9.99999974E-5 : f32
    %12 = vector.broadcast %cst_7 : f32 to vector<16x128xf32>
    %13 = arith.mulf %11, %12 : vector<16x128xf32>
    %c9 = arith.constant 9 : index
    %c0_8 = arith.constant 0 : index
    %c0_9 = arith.constant 0 : index
    %14 = vector.load %arg1[%c9, %c0_8, %c0_9] : memref<15x16x128xf32, #tpu.memory_space<vmem>>, vector<1x16x128xf32>
    %15 = vector.shape_cast %14 : vector<1x16x128xf32> to vector<16x128xf32>
    %16 = arith.mulf %15, %13 : vector<16x128xf32>
    %c0_10 = arith.constant 0 : index
    %c0_11 = arith.constant 0 : index
    %c0_12 = arith.constant 0 : index
    %17 = vector.load %arg2[%c0_10, %c0_11, %c0_12] : memref<9x16x128xf32, #tpu.memory_space<vmem>>, vector<1x16x128xf32>
    %18 = vector.shape_cast %17 : vector<1x16x128xf32> to vector<16x128xf32>
    %19 = vector.shape_cast %16 : vector<16x128xf32> to vector<1x16x128xf32>
    tpu.vector_store %arg2[%c0_10, %c0_11, %c0_12], %19 {strides = array<i32>} : memref<9x16x128xf32, #tpu.memory_space<vmem>>, vector<1x16x128xf32>,
    %c10 = arith.constant 10 : index
    %c0_13 = arith.constant 0 : index
    %c0_14 = arith.constant 0 : index
    %20 = vector.load %arg1[%c10, %c0_13, %c0_14] : memref<15x16x128xf32, #tpu.memory_space<vmem>>, vector<1x16x128xf32>
    %21 = vector.shape_cast %20 : vector<1x16x128xf32> to vector<16x128xf32>
    %22 = arith.mulf %21, %13 : vector<16x128xf32>
    %c1_15 = arith.constant 1 : index
    %c0_16 = arith.constant 0 : index
    %c0_17 = arith.constant 0 : index
    %23 = vector.load %arg2[%c1_15, %c0_16, %c0_17] : memref<9x16x128xf32, #tpu.memory_space<vmem>>, vector<1x16x128xf32>
    %24 = vector.shape_cast %23 : vector<1x16x128xf32> to vector<16x128xf32>
    %25 = vector.shape_cast %22 : vector<16x128xf32> to vector<1x16x128xf32>
    tpu.vector_store %arg2[%c1_15, %c0_16, %c0_17], %25 {strides = array<i32>} : memref<9x16x128xf32, #tpu.memory_space<vmem>>, vector<1x16x128xf32>,
    %c11 = arith.constant 11 : index
    %c0_18 = arith.constant 0 : index
    %c0_19 = arith.constant 0 : index
    %26 = vector.load %arg1[%c11, %c0_18, %c0_19] : memref<15x16x128xf32, #tpu.memory_space<vmem>>, vector<1x16x128xf32>
    %27 = vector.shape_cast %26 : vector<1x16x128xf32> to vector<16x128xf32>
    %28 = arith.mulf %27, %13 : vector<16x128xf32>
    %c2_20 = arith.constant 2 : index
    %c0_21 = arith.constant 0 : index
    %c0_22 = arith.constant 0 : index
    %29 = vector.load %arg2[%c2_20, %c0_21, %c0_22] : memref<9x16x128xf32, #tpu.memory_space<vmem>>, vector<1x16x128xf32>
    %30 = vector.shape_cast %29 : vector<1x16x128xf32> to vector<16x128xf32>
    %31 = vector.shape_cast %28 : vector<16x128xf32> to vector<1x16x128xf32>
    tpu.vector_store %arg2[%c2_20, %c0_21, %c0_22], %31 {strides = array<i32>} : memref<9x16x128xf32, #tpu.memory_space<vmem>>, vector<1x16x128xf32>,
    %c3 = arith.constant 3 : index
    %c0_23 = arith.constant 0 : index
    %c0_24 = arith.constant 0 : index
    %32 = vector.load %arg1[%c3, %c0_23, %c0_24] : memref<15x16x128xf32, #tpu.memory_space<vmem>>, vector<1x16x128xf32>
    %33 = vector.shape_cast %32 : vector<1x16x128xf32> to vector<16x128xf32>
    %c6 = arith.constant 6 : index
    %c0_25 = arith.constant 0 : index
    %c0_26 = arith.constant 0 : index
    %34 = vector.load %arg1[%c6, %c0_25, %c0_26] : memref<15x16x128xf32, #tpu.memory_space<vmem>>, vector<1x16x128xf32>
    %35 = vector.shape_cast %34 : vector<1x16x128xf32> to vector<16x128xf32>
    %36 = arith.mulf %33, %35 : vector<16x128xf32>
    %c4 = arith.constant 4 : index
    %c0_27 = arith.constant 0 : index
    %c0_28 = arith.constant 0 : index
    %37 = vector.load %arg1[%c4, %c0_27, %c0_28] : memref<15x16x128xf32, #tpu.memory_space<vmem>>, vector<1x16x128xf32>
    %38 = vector.shape_cast %37 : vector<1x16x128xf32> to vector<16x128xf32>
    %c7 = arith.constant 7 : index
    %c0_29 = arith.constant 0 : index
    %c0_30 = arith.constant 0 : index
    %39 = vector.load %arg1[%c7, %c0_29, %c0_30] : memref<15x16x128xf32, #tpu.memory_space<vmem>>, vector<1x16x128xf32>
    %40 = vector.shape_cast %39 : vector<1x16x128xf32> to vector<16x128xf32>
    %41 = arith.mulf %38, %40 : vector<16x128xf32>
    %42 = arith.addf %36, %41 : vector<16x128xf32>
    %c5 = arith.constant 5 : index
    %c0_31 = arith.constant 0 : index
    %c0_32 = arith.constant 0 : index
    %43 = vector.load %arg1[%c5, %c0_31, %c0_32] : memref<15x16x128xf32, #tpu.memory_space<vmem>>, vector<1x16x128xf32>
    %44 = vector.shape_cast %43 : vector<1x16x128xf32> to vector<16x128xf32>
    %c8 = arith.constant 8 : index
    %c0_33 = arith.constant 0 : index
    %c0_34 = arith.constant 0 : index
    %45 = vector.load %arg1[%c8, %c0_33, %c0_34] : memref<15x16x128xf32, #tpu.memory_space<vmem>>, vector<1x16x128xf32>
    %46 = vector.shape_cast %45 : vector<1x16x128xf32> to vector<16x128xf32>
    %47 = arith.mulf %44, %46 : vector<16x128xf32>
    %48 = arith.addf %42, %47 : vector<16x128xf32>
    %cst_35 = arith.constant 9.99999974E-6 : f32
    %cst_36 = arith.constant 0.999989986 : f32
    %49 = vector.broadcast %cst_35 : f32 to vector<16x128xf32>
    %50 = arith.maximumf %49, %48 : vector<16x128xf32>
    %51 = vector.broadcast %cst_36 : f32 to vector<16x128xf32>
    %52 = arith.minimumf %51, %50 : vector<16x128xf32>
    %cst_37 = arith.constant 1.000000e-10 : f32
    %53 = vector.broadcast %cst_37 : f32 to vector<16x128xf32>
    %54 = arith.addf %52, %53 : vector<16x128xf32>
    %cst_38 = arith.constant 1.000000e+00 : f32
    %55 = vector.broadcast %cst_38 : f32 to vector<16x128xf32>
    %56 = arith.divf %55, %54 : vector<16x128xf32>
    %57 = arith.mulf %52, %52 : vector<16x128xf32>
    %cst_39 = arith.constant 1.000000e+00 : f32
    %58 = vector.broadcast %cst_39 : f32 to vector<16x128xf32>
    %59 = arith.subf %58, %57 : vector<16x128xf32>
    %60 = arith.mulf %7, %7 : vector<16x128xf32>
    %cst_40 = arith.constant 1.000000e-10 : f32
    %61 = vector.broadcast %cst_40 : f32 to vector<16x128xf32>
    %62 = arith.addf %60, %61 : vector<16x128xf32>
    %63 = arith.divf %59, %62 : vector<16x128xf32>
    %64 = arith.addf %57, %63 : vector<16x128xf32>
    %cst_41 = arith.constant 3.14159274 : f32
    %65 = vector.broadcast %cst_41 : f32 to vector<16x128xf32>
    %66 = arith.mulf %65, %60 : vector<16x128xf32>
    %67 = arith.mulf %66, %64 : vector<16x128xf32>
    %68 = arith.mulf %67, %64 : vector<16x128xf32>
    %cst_42 = arith.constant 1.000000e-10 : f32
    %69 = vector.broadcast %cst_42 : f32 to vector<16x128xf32>
    %70 = arith.addf %68, %69 : vector<16x128xf32>
    %cst_43 = arith.constant 1.000000e+00 : f32
    %71 = vector.broadcast %cst_43 : f32 to vector<16x128xf32>
    %72 = arith.divf %71, %70 : vector<16x128xf32>
    %73 = arith.mulf %59, %59 : vector<16x128xf32>
    %cst_44 = arith.constant -6.074770e+01 : f32
    %74 = vector.broadcast %cst_44 : f32 to vector<16x128xf32>
    %75 = arith.subf %74, %59 : vector<16x128xf32>
    %76 = arith.mulf %75, %75 : vector<16x128xf32>
    %cst_45 = arith.constant 1794.67456 : f32
    %77 = vector.broadcast %cst_45 : f32 to vector<16x128xf32>
    %78 = arith.addf %76, %77 : vector<16x128xf32>
    %79 = math.sqrt %78 : vector<16x128xf32>
    %80 = arith.addf %79, %75 : vector<16x128xf32>
    %cst_46 = arith.constant 5.000000e-01 : f32
    %81 = vector.broadcast %cst_46 : f32 to vector<16x128xf32>
    %82 = arith.mulf %81, %80 : vector<16x128xf32>
    %83 = math.sqrt %82 : vector<16x128xf32>
    %84 = arith.addf %79, %57 : vector<16x128xf32>
    %cst_47 = arith.constant 2.000000e+00 : f32
    %85 = vector.broadcast %cst_47 : f32 to vector<16x128xf32>
    %86 = arith.mulf %85, %83 : vector<16x128xf32>
    %87 = arith.mulf %86, %52 : vector<16x128xf32>
    %88 = arith.subf %84, %87 : vector<16x128xf32>
    %89 = arith.addf %84, %87 : vector<16x128xf32>
    %90 = arith.divf %88, %89 : vector<16x128xf32>
    %91 = arith.mulf %79, %57 : vector<16x128xf32>
    %92 = arith.addf %91, %73 : vector<16x128xf32>
    %93 = arith.mulf %87, %59 : vector<16x128xf32>
    %94 = arith.subf %92, %93 : vector<16x128xf32>
    %95 = arith.mulf %90, %94 : vector<16x128xf32>
    %96 = arith.addf %92, %93 : vector<16x128xf32>
    %97 = arith.divf %95, %96 : vector<16x128xf32>
    %98 = arith.addf %97, %90 : vector<16x128xf32>
    %cst_48 = arith.constant 5.000000e-01 : f32
    %99 = vector.broadcast %cst_48 : f32 to vector<16x128xf32>
    %100 = arith.mulf %99, %98 : vector<16x128xf32>
    %101 = math.sqrt %59 : vector<16x128xf32>
    %102 = arith.mulf %7, %101 : vector<16x128xf32>
    %103 = arith.mulf %102, %56 : vector<16x128xf32>
    %104 = arith.mulf %103, %103 : vector<16x128xf32>
    %cst_49 = arith.constant 1.000000e+00 : f32
    %105 = vector.broadcast %cst_49 : f32 to vector<16x128xf32>
    %106 = arith.addf %104, %105 : vector<16x128xf32>
    %107 = math.sqrt %106 : vector<16x128xf32>
    %cst_50 = arith.constant 1.000000e+00 : f32
    %108 = vector.broadcast %cst_50 : f32 to vector<16x128xf32>
    %109 = arith.addf %108, %107 : vector<16x128xf32>
    %cst_51 = arith.constant 2.000000e+00 : f32
    %110 = vector.broadcast %cst_51 : f32 to vector<16x128xf32>
    %111 = arith.divf %110, %109 : vector<16x128xf32>
    %112 = arith.mulf %111, %111 : vector<16x128xf32>
    %113 = arith.mulf %11, %100 : vector<16x128xf32>
    %114 = arith.mulf %113, %72 : vector<16x128xf32>
    %115 = arith.mulf %114, %112 : vector<16x128xf32>
    %cst_52 = arith.constant 2.500000e-01 : f32
    %116 = vector.broadcast %cst_52 : f32 to vector<16x128xf32>
    %117 = arith.mulf %116, %56 : vector<16x128xf32>
    %118 = arith.mulf %115, %117 : vector<16x128xf32>
    %c12 = arith.constant 12 : index
    %c0_53 = arith.constant 0 : index
    %c0_54 = arith.constant 0 : index
    %119 = vector.load %arg1[%c12, %c0_53, %c0_54] : memref<15x16x128xf32, #tpu.memory_space<vmem>>, vector<1x16x128xf32>
    %120 = vector.shape_cast %119 : vector<1x16x128xf32> to vector<16x128xf32>
    %121 = arith.mulf %120, %118 : vector<16x128xf32>
    %c13 = arith.constant 13 : index
    %c0_55 = arith.constant 0 : index
    %c0_56 = arith.constant 0 : index
    %122 = vector.load %arg1[%c13, %c0_55, %c0_56] : memref<15x16x128xf32, #tpu.memory_space<vmem>>, vector<1x16x128xf32>
    %123 = vector.shape_cast %122 : vector<1x16x128xf32> to vector<16x128xf32>
    %124 = arith.mulf %123, %118 : vector<16x128xf32>
    %c14 = arith.constant 14 : index
    %c0_57 = arith.constant 0 : index
    %c0_58 = arith.constant 0 : index
    %125 = vector.load %arg1[%c14, %c0_57, %c0_58] : memref<15x16x128xf32, #tpu.memory_space<vmem>>, vector<1x16x128xf32>
    %126 = vector.shape_cast %125 : vector<1x16x128xf32> to vector<16x128xf32>
    %127 = arith.mulf %126, %118 : vector<16x128xf32>
    %c3_59 = arith.constant 3 : index
    %c0_60 = arith.constant 0 : index
    %c0_61 = arith.constant 0 : index
    %128 = vector.load %arg2[%c3_59, %c0_60, %c0_61] : memref<9x16x128xf32, #tpu.memory_space<vmem>>, vector<1x16x128xf32>
    %129 = vector.shape_cast %128 : vector<1x16x128xf32> to vector<16x128xf32>
    %130 = vector.shape_cast %121 : vector<16x128xf32> to vector<1x16x128xf32>
    tpu.vector_store %arg2[%c3_59, %c0_60, %c0_61], %130 {strides = array<i32>} : memref<9x16x128xf32, #tpu.memory_space<vmem>>, vector<1x16x128xf32>,
    %c4_62 = arith.constant 4 : index
    %c0_63 = arith.constant 0 : index
    %c0_64 = arith.constant 0 : index
    %131 = vector.load %arg2[%c4_62, %c0_63, %c0_64] : memref<9x16x128xf32, #tpu.memory_space<vmem>>, vector<1x16x128xf32>
    %132 = vector.shape_cast %131 : vector<1x16x128xf32> to vector<16x128xf32>
    %133 = vector.shape_cast %124 : vector<16x128xf32> to vector<1x16x128xf32>
    tpu.vector_store %arg2[%c4_62, %c0_63, %c0_64], %133 {strides = array<i32>} : memref<9x16x128xf32, #tpu.memory_space<vmem>>, vector<1x16x128xf32>,
    %c5_65 = arith.constant 5 : index
    %c0_66 = arith.constant 0 : index
    %c0_67 = arith.constant 0 : index
    %134 = vector.load %arg2[%c5_65, %c0_66, %c0_67] : memref<9x16x128xf32, #tpu.memory_space<vmem>>, vector<1x16x128xf32>
    %135 = vector.shape_cast %134 : vector<1x16x128xf32> to vector<16x128xf32>
    %136 = vector.shape_cast %127 : vector<16x128xf32> to vector<1x16x128xf32>
    tpu.vector_store %arg2[%c5_65, %c0_66, %c0_67], %136 {strides = array<i32>} : memref<9x16x128xf32, #tpu.memory_space<vmem>>, vector<1x16x128xf32>,
    %c0_68 = arith.constant 0 : index
    %c0_69 = arith.constant 0 : index
    %c0_70 = arith.constant 0 : index
    %137 = vector.load %arg2[%c0_68, %c0_69, %c0_70] : memref<9x16x128xf32, #tpu.memory_space<vmem>>, vector<1x16x128xf32>
    %138 = vector.shape_cast %137 : vector<1x16x128xf32> to vector<16x128xf32>
    %139 = arith.addf %138, %121 : vector<16x128xf32>
    %c6_71 = arith.constant 6 : index
    %c0_72 = arith.constant 0 : index
    %c0_73 = arith.constant 0 : index
    %140 = vector.load %arg2[%c6_71, %c0_72, %c0_73] : memref<9x16x128xf32, #tpu.memory_space<vmem>>, vector<1x16x128xf32>
    %141 = vector.shape_cast %140 : vector<1x16x128xf32> to vector<16x128xf32>
    %142 = vector.shape_cast %139 : vector<16x128xf32> to vector<1x16x128xf32>
    tpu.vector_store %arg2[%c6_71, %c0_72, %c0_73], %142 {strides = array<i32>} : memref<9x16x128xf32, #tpu.memory_space<vmem>>, vector<1x16x128xf32>,
    %c1_74 = arith.constant 1 : index
    %c0_75 = arith.constant 0 : index
    %c0_76 = arith.constant 0 : index
    %143 = vector.load %arg2[%c1_74, %c0_75, %c0_76] : memref<9x16x128xf32, #tpu.memory_space<vmem>>, vector<1x16x128xf32>
    %144 = vector.shape_cast %143 : vector<1x16x128xf32> to vector<16x128xf32>
    %145 = arith.addf %144, %124 : vector<16x128xf32>
    %c7_77 = arith.constant 7 : index
    %c0_78 = arith.constant 0 : index
    %c0_79 = arith.constant 0 : index
    %146 = vector.load %arg2[%c7_77, %c0_78, %c0_79] : memref<9x16x128xf32, #tpu.memory_space<vmem>>, vector<1x16x128xf32>
    %147 = vector.shape_cast %146 : vector<1x16x128xf32> to vector<16x128xf32>
    %148 = vector.shape_cast %145 : vector<16x128xf32> to vector<1x16x128xf32>
    tpu.vector_store %arg2[%c7_77, %c0_78, %c0_79], %148 {strides = array<i32>} : memref<9x16x128xf32, #tpu.memory_space<vmem>>, vector<1x16x128xf32>,
    %c2_80 = arith.constant 2 : index
    %c0_81 = arith.constant 0 : index
    %c0_82 = arith.constant 0 : index
    %149 = vector.load %arg2[%c2_80, %c0_81, %c0_82] : memref<9x16x128xf32, #tpu.memory_space<vmem>>, vector<1x16x128xf32>
    %150 = vector.shape_cast %149 : vector<1x16x128xf32> to vector<16x128xf32>
    %151 = arith.addf %150, %127 : vector<16x128xf32>
    %c8_83 = arith.constant 8 : index
    %c0_84 = arith.constant 0 : index
    %c0_85 = arith.constant 0 : index
    %152 = vector.load %arg2[%c8_83, %c0_84, %c0_85] : memref<9x16x128xf32, #tpu.memory_space<vmem>>, vector<1x16x128xf32>
    %153 = vector.shape_cast %152 : vector<1x16x128xf32> to vector<16x128xf32>
    %154 = vector.shape_cast %151 : vector<16x128xf32> to vector<1x16x128xf32>
    tpu.vector_store %arg2[%c8_83, %c0_84, %c0_85], %154 {strides = array<i32>} : memref<9x16x128xf32, #tpu.memory_space<vmem>>, vector<1x16x128xf32>,
    return
  }
  func.func @transform_0(%arg0: i32) -> (i32, i32, i32) {
    %c0_i32 = arith.constant 0 : i32
    %c0_i32_0 = arith.constant 0 : i32
    %c0_i32_1 = arith.constant 0 : i32
    return %c0_i32, %arg0, %c0_i32_0 : i32, i32, i32
  }
  func.func @transform_1(%arg0: i32) -> (i32, i32, i32) {
    %c0_i32 = arith.constant 0 : i32
    %c0_i32_0 = arith.constant 0 : i32
    %c0_i32_1 = arith.constant 0 : i32
    return %c0_i32, %arg0, %c0_i32_0 : i32, i32, i32
  }
}

</mosaic_0001>

<bundles_post_ra>
// kernel: tpu_custom_call.1
= control target key start
LH: loop header
LB: loop body
LE: loop exit
PB: predicated region body
PF: predicated region fallthrough
CT: control target
= control target key end

     0   :  { %6 = vsyncpa [#allocation3], 0  ;;  %s560_s0 = inlined_call_operand.hbm [shape: f32[15,16,128], index: 0, kind: input, shape index: {}]   ;;  %s561_s1 = inlined_call_operand.hbm [shape: f32[9,16,128], index: 1, kind: output, shape index: {}]  }
   0x1   :  { %7 = vsyncpa [#allocation4], 0  ;;  %s416_s6 = smov [#allocation2]   ;;  %s368_s10 = scalar_lea.hbm %s560_s0, 3840 }
   0x2   :  { %s13_s7 = sshll.u32 %s416_s6, 4  ;;  %p369_p0 = scmp.ne.s32.totalorder %s560_s0, %s368_s10  ;;  %s14_s7 = int_to_ptr.vmem [resolvable:$true] %s13_s7 }
   0x3   :  { %p372_p1 = scmp.lt.u32.totalorder %s368_s10, %s560_s0 }
   0x5   :  { %p374_p2 = pnand %p372_p1, %p369_p0 }
   0x7   :  { %377 = shalt.err (!%p374_p2)
}
   0x8   :  { %s378_s15 = scalar_lea.vmem %s14_s7, 3840  ;;  %p383_p4 = scmp.lt.s32.totalorder %s14_s7, %s14_s7 }
   0x9   :  { %p379_p3 = scmp.ne.s32.totalorder %s14_s7, %s378_s15  ;;  %p384_p5 = scmp.lt.s32.totalorder %s378_s15, %s378_s15 }
   0xb   :  { %p385_p6 = por %p384_p5, %p383_p4 }
   0xd   :  { %p386_p7 = pnand %p385_p6, %p379_p3 }
   0xf   :  { %389 = shalt.err (!%p386_p7)
}
  0x10   :  { %s417_s16 = smov 128   ;;  %s418_s17 = smov 8  }
  0x11   :  { %19 = dma.hbm_to_vmem [thread:$0]  %s560_s0, 3840, %s14_s7, [#allocation3], %s417_s16, %s417_s16, %s418_s17  }
  0x12   :  { %412 = dma.done.wait [#allocation3], 3840  }
  0x13   :  { %413 = vsyncadd [#allocation3], 4294963456  ;;  %v26_v0 = vld [vmem:[#allocation2 + $0x10] sm:$0xff]  ;;  %v70_v3 = vld [vmem:[#allocation2 + $0x60] sm:$0xff]  ;;  %s419_s0 = smov [#allocation5]  }
  0x14   :  { %v33_v1 = vmul.f32 %v26_v0, %v26_v0  ;;  %v67_v2 = vld [vmem:[#allocation2 + $0x30] sm:$0xff]  ;;  %v75_v4 = vld [vmem:[#allocation2 + $0x40] sm:$0xff]  ;;  %v27_v12 = vld [vmem:[#allocation2 + $0x18] sm:$0xff]  ;;  %s308_s20 = sshll.u32 %s419_s0, 4  ;;  %s309_s20 = int_to_ptr.vmem [resolvable:$true] %s308_s20 }
  0x15   :  { %v72_v5 = vmul.f32 %v70_v3, %v67_v2  ;;  %v78_v6 = vld [vmem:[#allocation2 + $0x70] sm:$0xff]  ;;  %v88_v8 = vld [vmem:[#allocation2 + $0x80] sm:$0xff]  ;;  %v34_v13 = vmul.f32 %v27_v12, %v27_v12  ;;  %v68_v14 = vld [vmem:[#allocation2 + $0x38] sm:$0xff]  ;;  %s390_s21 = scalar_lea.vmem %s309_s20, 2304  ;;  %p395_p9 = scmp.lt.s32.totalorder %s309_s20, %s309_s20 }
  0x16   :  { %v85_v7 = vld [vmem:[#allocation2 + $0x50] sm:$0xff]  ;;  %v35_v9 = vadd.f32 1e-10, %v33_v1  ;;  %v80_v10 = vmul.f32 %v78_v6, %v75_v4  ;;  %v71_v15 = vld [vmem:[#allocation2 + $0x68] sm:$0xff]  ;;  %v79_v19 = vld [vmem:[#allocation2 + $0x78] sm:$0xff]  ;;  %p391_p8 = scmp.ne.s32.totalorder %s309_s20, %s390_s21  ;;  %p396_p10 = scmp.lt.s32.totalorder %s390_s21, %s390_s21 }
  0x17   :  { %v90_v11 = vmul.f32 %v88_v8, %v85_v7  ;;  %v76_v16 = vld [vmem:[#allocation2 + $0x48] sm:$0xff]  ;;  %v73_v18 = vmul.f32 %v71_v15, %v68_v14  ;;  %v86_v20 = vld [vmem:[#allocation2 + $0x58] sm:$0xff]  ;;  %v36_v22 = vadd.f32 1e-10, %v34_v13  ;;  %v23_v31 = vld [vmem:[#allocation2] sm:$0xff] }
  0x18   :  { %324 = vrcp.f32 %v35_v9  ;;  %v82_v17 = vadd.f32 %v80_v10, %v72_v5  ;;  %v89_v21 = vld [vmem:[#allocation2 + $0x88] sm:$0xff]  ;;  %v81_v23 = vmul.f32 %v79_v19, %v76_v16  ;;  %v44_v40 = vld [vmem:[#allocation2 + $0x90] sm:$0xff]  ;;  %v51_v42 = vld [vmem:[#allocation2 + $0xa0] sm:$0xff]  ;;  %p397_p11 = por %p396_p10, %p395_p9 }
  0x19   :  { %v91_v24 = vmul.f32 %v89_v21, %v86_v20  ;;  %326 = vrcp.f32 %v36_v22  ;;  %v24_v37 = vld [vmem:[#allocation2 + $0x8] sm:$0xff]  ;;  %v59_v46 = vld [vmem:[#allocation2 + $0xb0] sm:$0xff]  ;;  %v45_v50 = vld [vmem:[#allocation2 + $0x98] sm:$0xff] }
  0x1a   :  { %v92_v25 = vadd.f32 %v90_v11, %v82_v17  ;;  %v83_v26 = vadd.f32 %v81_v23, %v73_v18  ;;  %v52_v55 = vld [vmem:[#allocation2 + $0xa8] sm:$0xff]  ;;  %v60_v57 = vld [vmem:[#allocation2 + $0xb8] sm:$0xff]  ;;  %v29_v59 = vld [vmem:[#allocation2 + $0x20] sm:$0xff]  ;;  %p398_p12 = pnand %p397_p11, %p391_p8 }
  0x1b   :  { %v30_v1 = vld [vmem:[#allocation2 + $0x28] sm:$0xff]  ;;  %v31_v2 = vmax.f32 %v29_v59, 0.0001 }
  0x1c   :  { %v94_v27 = vmax.f32 %v92_v25, 1e-05  ;;  %v93_v28 = vadd.f32 %v91_v24, %v83_v26  ;;  %v32_v5 = vmax.f32 %v30_v1, 0.0001 }
  0x1d   :  { %v108_v7 = vmul.f32 %v31_v2, %v31_v2 }
  0x1e   :  { %v445_v29 = vmin.f32 %v94_v27, 0.99999  ;;  %v95_v30 = vmax.f32 %v93_v28, 1e-05  ;;  %v109_v8 = vmul.f32 %v32_v5, %v32_v5 }
  0x1f   :  { %v110_v18 = vadd.f32 1e-10, %v108_v7 }
  0x20   :  { %v449_v32 = vmul.f32 %v445_v29, %v445_v29  ;;  %v451_v33 = vmin.f32 %v95_v30, 0.99999  ;;  %v98_v39 = vadd.f32 1e-10, %v445_v29  ;;  %v111_v19 = vadd.f32 1e-10, %v109_v8 }
  0x21   :  { %v119_v1 = vmul.f32 3.1415927, %v109_v8 }
  0x22   :  { %v325_v34 = vpop.eup %324  ;;  %v454_v35 = vsub.f32 1.0, %v449_v32  ;;  %v460_v38 = vmul.f32 %v451_v33, %v451_v33  ;;  %v99_v60 = vadd.f32 1e-10, %v451_v33 }
  0x23   :  { %v456_v36 = vmul.f32 %v325_v34, %v23_v31  ;;  %v327_v43 = vpop.eup %326 }
  0x24   :  { %v464_v41 = vsub.f32 -60.7477, %v454_v35  ;;  %328 = vrsqrt.f32 %v454_v35  ;;  %v469_v45 = vsub.f32 1.0, %v460_v38  ;;  %v473_v48 = vmul.f32 %v327_v43, %v24_v37 }
  0x25   :  { %v41_v44 = vmul.f32 0.0001, %v456_v36  ;;  %330 = vrcp.f32 %v98_v39  ;;  %vm206_vm0 = vcmp.eq.f32.partialorder %v454_v35, inf  ;;  %v209_v4 = vand.u32 2147483648, %v454_v35 }
  0x26   :  { %v134_v47 = vmul.f32 %v464_v41, %v464_v41  ;;  %v478_v51 = vsub.f32 -60.7477, %v469_v45  ;;  %v42_v54 = vmul.f32 0.0001, %v473_v48  ;;  %332 = vrsqrt.f32 %v469_v45 }
  0x27   :  { %v475_v49 = vmul.f32 %v44_v40, %v41_v44  ;;  %v480_v52 = vmul.f32 %v51_v42, %v41_v44  ;;  %v483_v56 = vmul.f32 %v59_v46, %v41_v44  ;;  %vm208_vm1 = vcmp.eq.f32.partialorder %v454_v35, 0.0 }
  0x28   :  { %v136_v53 = vadd.f32 1794.6746, %v134_v47  ;;  %v135_v58 = vmul.f32 %v478_v51, %v478_v51  ;;  %v492_v61 = vmul.f32 %v45_v50, %v42_v54  ;;  %v494_v63 = vmul.f32 %v52_v55, %v42_v54 }
  0x29   :  { %48 = vst [vmem:[#allocation5] sm:$0xff] %v475_v49  ;;  %56 = vst [vmem:[#allocation5 + $0x10] sm:$0xff] %v480_v52  ;;  %v496_v0 = vmul.f32 %v60_v57, %v42_v54  ;;  %vm213_vm2 = vcmp.eq.f32.partialorder %v469_v45, inf  ;;  %v216_v13 = vand.u32 2147483648, %v469_v45  ;;  %vm215_vm3 = vcmp.eq.f32.partialorder %v469_v45, 0.0 }
  0x2a   :  { %334 = vrsqrt.f32 %v136_v53  ;;  %64 = vst [vmem:[#allocation5 + $0x20] sm:$0xff] %v483_v56  ;;  %v137_v62 = vadd.f32 1794.6746, %v135_v58  ;;  %49 = vst [vmem:[#allocation5 + $0x8] sm:$0xff] %v492_v61  ;;  %vm140_vm4 = vcmp.eq.f32.partialorder %v136_v53, inf  ;;  %v143_v17 = vand.u32 2147483648, %v136_v53 }
  0x2b   :  { %57 = vst [vmem:[#allocation5 + $0x18] sm:$0xff] %v494_v63  ;;  %65 = vst [vmem:[#allocation5 + $0x28] sm:$0xff] %v496_v0  ;;  %vm142_vm5 = vcmp.eq.f32.partialorder %v136_v53, 0.0 }
  0x2c   :  { %336 = vrsqrt.f32 %v137_v62  ;;  %vm147_vm6 = vcmp.eq.f32.partialorder %v137_v62, inf  ;;  %v150_v26 = vand.u32 2147483648, %v137_v62  ;;  %vm149_vm7 = vcmp.eq.f32.partialorder %v137_v62, 0.0 }
  0x2d   :  { %338 = vrcp.f32 %v99_v60 }
  0x2e   :  { %v329_v3 = vpop.eup %328  ;;  %340 = vrcp.f32 %v110_v18 }
  0x2f   :  { %v205_v6 = vmul.f32 %v329_v3, %v454_v35  ;;  %v505_v9 = vpop.eup %330  ;;  %342 = vrcp.f32 %v111_v19 }
  0x30   :  { %v333_v11 = vpop.eup %332 }
  0x31   :  { %v207_v10 = vsel %vm206_vm0, %v454_v35, %v205_v6  ;;  %v212_v15 = vmul.f32 %v333_v11, %v469_v45 }
  0x32   :  { %v210_v12 = vsel %vm208_vm1, %v209_v4, %v207_v10 }
  0x33   :  { %v218_v14 = vmul.f32 %v210_v12, %v31_v2  ;;  %v214_v22 = vsel %vm213_vm2, %v469_v45, %v212_v15 }
  0x34   :  { %v335_v16 = vpop.eup %334  ;;  %v217_v23 = vsel %vm215_vm3, %v216_v13, %v214_v22 }
  0x35   :  { %v139_v20 = vmul.f32 %v335_v16, %v136_v53  ;;  %v220_v21 = vmul.f32 %v505_v9, %v218_v14  ;;  %v219_v28 = vmul.f32 %v217_v23, %v32_v5  ;;  %v131_v5 = vmul.f32 %v469_v45, %v469_v45 }
  0x36   :  { %v337_v24 = vpop.eup %336 }
  0x37   :  { %v141_v25 = vsel %vm140_vm4, %v136_v53, %v139_v20  ;;  %v222_v27 = vmul.f32 %v220_v21, %v220_v21  ;;  %v514_v30 = vpop.eup %338  ;;  %v146_v34 = vmul.f32 %v337_v24, %v137_v62 }
  0x38   :  { %v144_v31 = vsel %vm142_vm5, %v143_v17, %v141_v25  ;;  %v221_v44 = vmul.f32 %v514_v30, %v219_v28  ;;  %v341_v54 = vpop.eup %340 }
  0x39   :  { %v152_v37 = vadd.f32 %v144_v31, %v464_v41  ;;  %v224_v39 = vadd.f32 1.0, %v222_v27  ;;  %v148_v40 = vsel %vm147_vm6, %v137_v62, %v146_v34  ;;  %v343_v55 = vpop.eup %342  ;;  %v113_v41 = vmul.f32 %v341_v54, %v454_v35 }
  0x3a   :  { %v151_v43 = vsel %vm149_vm7, %v150_v26, %v148_v40  ;;  %v223_v50 = vmul.f32 %v221_v44, %v221_v44  ;;  %v115_v58 = vmul.f32 %v343_v55, %v469_v45  ;;  %v118_v62 = vmul.f32 3.1415927, %v108_v7 }
  0x3b   :  { %v154_v42 = vmul.f32 0.5, %v152_v37  ;;  %344 = vrsqrt.f32 %v224_v39  ;;  %v153_v46 = vadd.f32 %v151_v43, %v478_v51  ;;  %v130_v51 = vmul.f32 %v454_v35, %v454_v35 }
  0x3c   :  { %v225_v53 = vadd.f32 1.0, %v223_v50  ;;  %v184_v4 = vmul.f32 %v144_v31, %v449_v32  ;;  %v116_v6 = vadd.f32 %v113_v41, %v449_v32  ;;  %vm228_vm10 = vcmp.eq.f32.partialorder %v224_v39, inf }
  0x3d   :  { %346 = vrsqrt.f32 %v154_v42  ;;  %v155_v47 = vmul.f32 0.5, %v153_v46  ;;  %vm158_vm8 = vcmp.eq.f32.partialorder %v154_v42, inf  ;;  %v161_v60 = vand.u32 2147483648, %v154_v42 }
  0x3e   :  { %vm160_vm9 = vcmp.eq.f32.partialorder %v154_v42, 0.0  ;;  %v117_v7 = vadd.f32 %v115_v58, %v460_v38  ;;  %v231_v14 = vand.u32 2147483648, %v224_v39  ;;  %v170_v15 = vadd.f32 %v144_v31, %v449_v32 }
  0x3f   :  { %348 = vrsqrt.f32 %v155_v47  ;;  %vm165_vm11 = vcmp.eq.f32.partialorder %v155_v47, inf  ;;  %v168_v12 = vand.u32 2147483648, %v155_v47  ;;  %vm167_vm12 = vcmp.eq.f32.partialorder %v155_v47, 0.0 }
  0x40   :  { %350 = vrsqrt.f32 %v225_v53  ;;  %vm230_vm13 = vcmp.eq.f32.partialorder %v224_v39, 0.0  ;;  %v186_v19 = vadd.f32 %v184_v4, %v130_v51  ;;  %v185_v21 = vmul.f32 %v151_v43, %v460_v38 }
  0x41   :  { %vm235_vm14 = vcmp.eq.f32.partialorder %v225_v53, inf  ;;  %v238_v25 = vand.u32 2147483648, %v225_v53  ;;  %v171_v26 = vadd.f32 %v151_v43, %v460_v38  ;;  %vm237_vm15 = vcmp.eq.f32.partialorder %v225_v53, 0.0 }
  0x42   :  { %v120_v34 = vmul.f32 %v118_v62, %v116_v6  ;;  %v187_v40 = vadd.f32 %v185_v21, %v131_v5  ;;  %v121_v50 = vmul.f32 %v119_v1, %v117_v7 }
  0x44   :  { %v122_v38 = vmul.f32 %v120_v34, %v116_v6 }
  0x45   :  { %v345_v57 = vpop.eup %344 }
  0x46   :  { %v227_v3 = vmul.f32 %v345_v57, %v224_v39 }
  0x47   :  { %v347_v59 = vpop.eup %346 }
  0x48   :  { %v157_v2 = vmul.f32 %v347_v59, %v154_v42  ;;  %v229_v17 = vsel %vm228_vm10, %v224_v39, %v227_v3 }
  0x49   :  { %v349_v10 = vpop.eup %348  ;;  %v232_v28 = vsel %vm230_vm13, %v231_v14, %v229_v17 }
  0x4a   :  { %v159_v11 = vsel %vm158_vm8, %v154_v42, %v157_v2  ;;  %v164_v13 = vmul.f32 %v349_v10, %v155_v47  ;;  %v351_v18 = vpop.eup %350  ;;  %v240_v44 = vadd.f32 1.0, %v232_v28  ;;  %v269_v28 = vld [vmem:[#allocation2 + $0xe0] sm:$0xff] }
  0x4b   :  { %v162_v8 = vsel %vm160_vm9, %v161_v60, %v159_v11  ;;  %v234_v24 = vmul.f32 %v351_v18, %v225_v53 }
  0x4c   :  { %v172_v16 = vmul.f32 2.0, %v162_v8  ;;  %v166_v20 = vsel %vm165_vm11, %v155_v47, %v164_v13 }
  0x4d   :  { %v169_v23 = vsel %vm167_vm12, %v168_v12, %v166_v20  ;;  %v236_v37 = vsel %vm235_vm14, %v225_v53, %v234_v24  ;;  %v124_v53 = vadd.f32 1e-10, %v122_v38  ;;  %v254_v20 = vmul.f32 0.25, %v505_v9  ;;  %v259_v24 = vld [vmem:[#allocation2 + $0xc0] sm:$0xff] }
  0x4e   :  { %v174_v22 = vmul.f32 %v172_v16, %v445_v29  ;;  %v173_v27 = vmul.f32 2.0, %v169_v23  ;;  %v239_v29 = vsel %vm237_vm15, %v238_v25, %v236_v37 }
  0x4f   :  { %v241_v54 = vadd.f32 1.0, %v239_v29 }
  0x50   :  { %v178_v32 = vadd.f32 %v174_v22, %v170_v15  ;;  %v188_v31 = vmul.f32 %v174_v22, %v454_v35  ;;  %v175_v39 = vmul.f32 %v173_v27, %v451_v33  ;;  %v123_v35 = vmul.f32 %v121_v50, %v117_v7  ;;  %v264_v27 = vld [vmem:[#allocation2 + $0xd0] sm:$0xff] }
  0x51   :  { %v176_v55 = vsub.f32 %v170_v15, %v174_v22 }
  0x52   :  { %352 = vrcp.f32 %v178_v32  ;;  %v194_v42 = vadd.f32 %v188_v31, %v186_v19  ;;  %v179_v46 = vadd.f32 %v175_v39, %v171_v26  ;;  %v189_v47 = vmul.f32 %v175_v39, %v469_v45 }
  0x53   :  { %v190_v33 = vsub.f32 %v186_v19, %v188_v31  ;;  %v125_v57 = vadd.f32 1e-10, %v123_v35  ;;  %v177_v58 = vsub.f32 %v171_v26, %v175_v39  ;;  %v255_v26 = vmul.f32 0.25, %v514_v30  ;;  %v265_v39 = vld [vmem:[#allocation2 + $0xd8] sm:$0xff] }
  0x54   :  { %354 = vrcp.f32 %v194_v42  ;;  %v195_v43 = vadd.f32 %v189_v47, %v187_v40  ;;  %v191_v45 = vsub.f32 %v187_v40, %v189_v47  ;;  %v270_v42 = vld [vmem:[#allocation2 + $0xe8] sm:$0xff] }
  0x55   :  { %356 = vrcp.f32 %v179_v46 }
  0x56   :  { %358 = vrcp.f32 %v240_v44 }
  0x57   :  { %360 = vrcp.f32 %v195_v43 }
  0x58   :  { %362 = vrcp.f32 %v241_v54 }
  0x59   :  { %364 = vrcp.f32 %v124_v53 }
  0x5a   :  { %366 = vrcp.f32 %v125_v57 }
  0x5c   :  { %v353_v41 = vpop.eup %352 }
  0x5d   :  { %v181_v59 = vmul.f32 %v353_v41, %v176_v55 }
  0x5e   :  { %v355_v60 = vpop.eup %354 }
  0x5f   :  { %v357_v62 = vpop.eup %356  ;;  %v192_v1 = vmul.f32 %v190_v33, %v181_v59 }
  0x60   :  { %v359_v51 = vpop.eup %358  ;;  %v183_v2 = vmul.f32 %v357_v62, %v177_v58 }
  0x61   :  { %v361_v3 = vpop.eup %360  ;;  %v197_v4 = vmul.f32 %v355_v60, %v192_v1  ;;  %v243_v11 = vmul.f32 2.0, %v359_v51 }
  0x62   :  { %v193_v5 = vmul.f32 %v191_v45, %v183_v2  ;;  %v363_v6 = vpop.eup %362 }
  0x63   :  { %v200_v10 = vadd.f32 %v197_v4, %v181_v59  ;;  %v365_v8 = vpop.eup %364  ;;  %v245_v14 = vmul.f32 2.0, %v363_v6  ;;  %v246_v16 = vmul.f32 %v243_v11, %v243_v11 }
  0x64   :  { %v199_v12 = vmul.f32 %v361_v3, %v193_v5  ;;  %v367_v18 = vpop.eup %366 }
  0x65   :  { %v202_v7 = vmul.f32 0.5, %v200_v10  ;;  %v247_v22 = vmul.f32 %v245_v14, %v245_v14 }
  0x66   :  { %v201_v13 = vadd.f32 %v199_v12, %v183_v2 }
  0x67   :  { %v248_v15 = vmul.f32 %v202_v7, %v456_v36  ;;  %v260_v36 = vld [vmem:[#allocation2 + $0xc8] sm:$0xff] }
  0x68   :  { %v203_v17 = vmul.f32 0.5, %v201_v13 }
  0x69   :  { %v250_v19 = vmul.f32 %v365_v8, %v248_v15 }
  0x6a   :  { %v249_v21 = vmul.f32 %v203_v17, %v473_v48 }
  0x6b   :  { %v252_v23 = vmul.f32 %v250_v19, %v246_v16 }
  0x6c   :  { %v251_v25 = vmul.f32 %v367_v18, %v249_v21 }
  0x6d   :  { %v256_v32 = vmul.f32 %v254_v20, %v252_v23 }
  0x6e   :  { %v253_v31 = vmul.f32 %v251_v25, %v247_v22 }
  0x6f   :  { %v261_v34 = vmul.f32 %v259_v24, %v256_v32  ;;  %v266_v37 = vmul.f32 %v264_v27, %v256_v32  ;;  %v271_v40 = vmul.f32 %v269_v28, %v256_v32 }
  0x70   :  { %v257_v44 = vmul.f32 %v255_v26, %v253_v31 }
  0x71   :  { %274 = vst [vmem:[#allocation5 + $0x30] sm:$0xff] %v261_v34  ;;  %277 = vst [vmem:[#allocation5 + $0x40] sm:$0xff] %v266_v37  ;;  %v284_v48 = vadd.f32 %v261_v34, %v475_v49  ;;  %v291_v9 = vadd.f32 %v266_v37, %v480_v52  ;;  %v298_v30 = vadd.f32 %v271_v40, %v483_v56 }
  0x72   :  { %280 = vst [vmem:[#allocation5 + $0x50] sm:$0xff] %v271_v40  ;;  %v262_v29 = vmul.f32 %v260_v36, %v257_v44  ;;  %v267_v46 = vmul.f32 %v265_v39, %v257_v44  ;;  %v272_v47 = vmul.f32 %v270_v42, %v257_v44 }
  0x73   :  { %287 = vst [vmem:[#allocation5 + $0x60] sm:$0xff] %v284_v48  ;;  %294 = vst [vmem:[#allocation5 + $0x70] sm:$0xff] %v291_v9 }
  0x74   :  { %301 = vst [vmem:[#allocation5 + $0x80] sm:$0xff] %v298_v30  ;;  %275 = vst [vmem:[#allocation5 + $0x38] sm:$0xff] %v262_v29  ;;  %v285_v50 = vadd.f32 %v262_v29, %v492_v61  ;;  %v292_v38 = vadd.f32 %v267_v46, %v494_v63  ;;  %v299_v49 = vadd.f32 %v272_v47, %v496_v0 }
  0x75   :  { %278 = vst [vmem:[#allocation5 + $0x48] sm:$0xff] %v267_v46  ;;  %281 = vst [vmem:[#allocation5 + $0x58] sm:$0xff] %v272_v47 }
  0x76   :  { %288 = vst [vmem:[#allocation5 + $0x68] sm:$0xff] %v285_v50  ;;  %295 = vst [vmem:[#allocation5 + $0x78] sm:$0xff] %v292_v38 }
  0x77   :  { %302 = vst [vmem:[#allocation5 + $0x88] sm:$0xff] %v299_v49 }
  0x78   :  { %401 = shalt.err (!%p398_p12)
}
  0x79   :  { %s402_s24 = scalar_lea.hbm %s561_s1, 2304 }
  0x7a   :  { %p403_p13 = scmp.ne.s32.totalorder %s561_s1, %s402_s24  ;;  %p406_p0 = scmp.lt.u32.totalorder %s402_s24, %s561_s1 }
  0x7c   :  { %p408_p1 = pnand %p406_p0, %p403_p13 }
  0x7e   :  { %411 = shalt.err (!%p408_p1)
}
  0x7f   :  { %314 = dma.vmem_to_hbm [thread:$0]  %s309_s20, 2304, %s561_s1, [#allocation4], %s417_s16, %s417_s16, %s418_s17  }
  0x80   :  { %414 = dma.done.wait [#allocation4], 2304  }
  0x81   :  { %415 = vsyncadd [#allocation4], 4294964992 }
  0x82   :  { %318 = vsyncpa [#allocation3], 1 }
  0x83   :  { %319 = vsyncpa [#allocation4], 1 }

</bundles_post_ra>
